<compile_context>
chip_gen: v6e
topology: v6e:2x2x1
jax: 0.10.0
libtpu: 0.0.40
codegen_flags: <defaults>
</compile_context>

<pallas_src>
import functools

import jax
import jax.numpy as jnp
from jax.experimental import pallas as pl
from jax.experimental.pallas import tpu as pltpu


def _round_up(x: int, m: int) -> int:
    return ((x + m - 1) // m) * m


def _lane_pad(n: int) -> int:
    # 128-lane padding; bump to 256 multiples once the dim exceeds 128 so the
    # 256-wide v6e/v7x MXU is fully fed (v5e is already full at 128).
    return _round_up(n, 256 if n > 128 else 128)


# ----------------------------------------------------------------------------
# Pallas kernel: fused 3-layer MLP forward on one (TB, NI_p) batch tile.
# Weights/biases are VMEM-resident across all grid steps (constant index_map,
# single-buffered); only the state/out tiles stream.
# ----------------------------------------------------------------------------
def actor_mlp_kernel(state_ref, w1_ref, b1_ref, w2_ref, b2_ref, w3_ref, b3_ref,
                     out_ref):
    x = state_ref[...]                                   # (TB, NI_p)
    h1 = jnp.dot(x, w1_ref[...], preferred_element_type=jnp.float32) + b1_ref[...]
    h1 = jnp.maximum(h1, 0.0).astype(w2_ref.dtype)       # ReLU, back to MXU dtype
    h2 = jnp.dot(h1, w2_ref[...], preferred_element_type=jnp.float32) + b2_ref[...]
    h2 = jnp.maximum(h2, 0.0).astype(w3_ref.dtype)       # ReLU
    h3 = jnp.dot(h2, w3_ref[...], preferred_element_type=jnp.float32) + b3_ref[...]
    out_ref[...] = jnp.tanh(h3)                          # (TB, NA_p) f32, lane-dense


def actor_mlp_pallas(state, padded_params, *, block_b=512):
    """Fused MLP over pre-padded params. Returns the padded (B_p, NA_p) output."""
    w1, b1, w2, b2, w3, b3 = padded_params
    B, NI = state.shape
    NI_p, H_p = w1.shape
    NA_p = w3.shape[1]

    # Batch tile: multiple of 8 sublanes, capped at block_b AND at ceil(B/2) so
    # that whenever B > 8 there are >= 2 grid steps for v7x's two TensorCores.
    TB = min(block_b, max(8, _round_up(pl.cdiv(B, 2), 8)))
    n_blocks = pl.cdiv(B, TB)
    B_p = n_blocks * TB

    # Single fused pad (batch + feature axes) + cast; padded rows/cols are zero
    # and contribute nothing to the dots; padded output columns are sliced off
    # by the caller.
    state_p = jnp.pad(state, ((0, B_p - B), (0, NI_p - NI))).astype(w1.dtype)

    # Derived VMEM budget: resident weights (single buffer) + biases +
    # double-buffered state/out tiles + f32 intermediates, with 2x margin.
    w_bytes = sum(int(a.size) * a.dtype.itemsize for a in (w1, w2, w3))
    b_bytes = sum(int(a.size) * a.dtype.itemsize for a in (b1, b2, b3))
    io_bytes = 2 * (TB * NI_p * state_p.dtype.itemsize + TB * NA_p * 4)
    interm_bytes = 3 * TB * H_p * 4
    need = w_bytes + b_bytes + io_bytes + interm_bytes
    vmem_limit = int(min(max(2 * need + (1 << 20), 8 << 20), 48 << 20))

    flops = 2 * B_p * (NI_p * H_p + H_p * H_p + H_p * NA_p)
    bytes_accessed = (w_bytes + b_bytes
                      + int(state_p.size) * state_p.dtype.itemsize
                      + B_p * NA_p * 4)

    # Never-changing blocks: constant index_map + single buffer (no pointless
    # double-buffering of resident weights).
    resident = pl.Buffered(buffer_count=1)

    out_padded = pl.pallas_call(
        actor_mlp_kernel,
        out_shape=jax.ShapeDtypeStruct((B_p, NA_p), jnp.float32),
        grid_spec=pltpu.PrefetchScalarGridSpec(
            num_scalar_prefetch=0,
            grid=(n_blocks,),
            in_specs=[
                pl.BlockSpec((TB, NI_p), lambda i: (i, 0)),           # state tile
                pl.BlockSpec((NI_p, H_p), lambda i: (0, 0), pipeline_mode=resident),
                pl.BlockSpec((1, H_p), lambda i: (0, 0), pipeline_mode=resident),
                pl.BlockSpec((H_p, H_p), lambda i: (0, 0), pipeline_mode=resident),
                pl.BlockSpec((1, H_p), lambda i: (0, 0), pipeline_mode=resident),
                pl.BlockSpec((H_p, NA_p), lambda i: (0, 0), pipeline_mode=resident),
                pl.BlockSpec((1, NA_p), lambda i: (0, 0), pipeline_mode=resident),
            ],
            out_specs=pl.BlockSpec((TB, NA_p), lambda i: (i, 0)),
        ),
        compiler_params=pltpu.CompilerParams(
            dimension_semantics=("parallel",),     # megacore split on v7x
            vmem_limit_bytes=vmem_limit,
        ),
        cost_estimate=pl.CostEstimate(
            flops=int(flops),
            transcendentals=int(B_p * NA_p),
            bytes_accessed=int(bytes_accessed),
        ),
    )(state_p, w1, b1, w2, b2, w3, b3)

    return out_padded


def _plain_mlp(state, padded_params):
    """Plain-XLA fallback with the exact same math as the kernel."""
    w1, b1, w2, b2, w3, b3 = padded_params
    NI_p = w1.shape[0]
    x = jnp.pad(state, ((0, 0), (0, NI_p - state.shape[1]))).astype(w1.dtype)
    h1 = jnp.maximum(jnp.dot(x, w1, preferred_element_type=jnp.float32) + b1,
                     0.0).astype(w2.dtype)
    h2 = jnp.maximum(jnp.dot(h1, w2, preferred_element_type=jnp.float32) + b2,
                     0.0).astype(w3.dtype)
    return jnp.tanh(jnp.dot(h2, w3, preferred_element_type=jnp.float32) + b3)


# ----------------------------------------------------------------------------
# Plain-JAX glue: parameter init (PyTorch-Linear-style) and state building.
# ----------------------------------------------------------------------------
def init_linear(key, in_features, out_features, init_range=None):
    """Init matching nn.Linear defaults (or uniform(+-r) for the last layer)."""
    kw, kb = jax.random.split(key)
    bound = (1.0 / float(in_features) ** 0.5) if init_range is None else float(init_range)
    # stored as (in, out) for x @ W
    w = jax.random.uniform(kw, (in_features, out_features), jnp.float32,
                           minval=-bound, maxval=bound)
    b = jax.random.uniform(kb, (1, out_features), jnp.float32,
                           minval=-bound, maxval=bound)
    return w, b


def state_representation(info, rewards, window_size):
    """Stand-in for the undefined StateRepresentation module:
    flatten the trailing `window_size` rows of `info` and concat rewards."""
    B = info.shape[0]
    windowed = info[:, -window_size:, :]                 # (B, W, F)
    flat = windowed.reshape(B, -1)                       # (B, W*F)
    return jnp.concatenate([flat, rewards], axis=-1)     # (B, W*F + R)


def _actor_forward(info, rewards, padded_params, *, window_size, number_inputs,
                   number_actions, block_b, use_pallas):
    state = state_representation(info, rewards, window_size)    # (B, NI) f32
    if use_pallas:
        out_padded = actor_mlp_pallas(state, padded_params, block_b=block_b)
    else:
        out_padded = _plain_mlp(state, padded_params)
    action = out_padded[:state.shape[0], :number_actions]
    return state, action


class ActorNetworkPallas:
    def __init__(self, number_inputs, number_actions, hidden_size, window_size,
                 initial_weights=0.02, key=None, param_dtype=jnp.bfloat16,
                 block_b=512, use_pallas=True):
        if key is None:
            key = jax.random.PRNGKey(42)
        self.window_size = window_size
        self.number_inputs = number_inputs
        self.number_actions = number_actions

        k1, k2, k3 = jax.random.split(key, 3)
        w1, b1 = init_linear(k1, number_inputs, hidden_size)
        w2, b2 = init_linear(k2, hidden_size, hidden_size)
        w3, b3 = init_linear(k3, hidden_size, number_actions,
                             init_range=initial_weights)

        # Unpadded params (kept for reference / inspection).
        self.w1, self.b1 = w1.astype(param_dtype), b1
        self.w2, self.b2 = w2.astype(param_dtype), b2
        self.w3, self.b3 = w3.astype(param_dtype), b3

        # Pad + cast ONCE at init (not per forward). Feature dims lane-padded.
        NI_p, H_p, NA_p = _lane_pad(number_inputs), _lane_pad(hidden_size), \
            _round_up(number_actions, 128)

        def pad2(a, rows, cols, dtype):
            r, c = a.shape
            return jnp.pad(a, ((0, rows - r), (0, cols - c))).astype(dtype)

        self._padded_params = (
            pad2(w1, NI_p, H_p, param_dtype),
            pad2(b1, 1, H_p, jnp.float32),
            pad2(w2, H_p, H_p, param_dtype),
            pad2(b2, 1, H_p, jnp.float32),
            pad2(w3, H_p, NA_p, param_dtype),
            pad2(b3, 1, NA_p, jnp.float32),
        )

        # One jitted forward: state build + pad + pallas_call + slice all fuse.
        self._forward = jax.jit(functools.partial(
            _actor_forward,
            window_size=window_size,
            number_inputs=number_inputs,
            number_actions=number_actions,
            block_b=block_b,
            use_pallas=use_pallas,
        ))

    def forward(self, info, rewards):
        return self._forward(info, rewards, self._padded_params)

    def get_action(self, info, rewards):
        return self.forward(info, rewards)


# ----------------------------------------------------------------------------
if __name__ == "__main__":
    # Small, self-consistent shapes:
    B = 2              # batch
    W = 8              # window_size
    F = 3              # features per timestep in `info`
    R = 8              # reward features
    NI = W * F + R     # number_inputs = 32
    H = 32             # hidden_size
    NA = 4             # number_actions

    key = jax.random.PRNGKey(0)
    k_info, k_rew = jax.random.split(key)
    info = jax.random.normal(k_info, (B, W, F), jnp.float32)
    rewards = jax.random.normal(k_rew, (B, R), jnp.float32)

    net = ActorNetworkPallas(number_inputs=NI, number_actions=NA,
                             hidden_size=H, window_size=W,
                             initial_weights=0.02, use_pallas=True)

    state, action = net.get_action(info, rewards)
    jax.block_until_ready((state, action))

    # Pure-JAX reference of the kernel math (same bf16-in / f32-acc recipe).
    s_bf = state.astype(jnp.bfloat16)
    h1 = jnp.maximum(
        jnp.dot(s_bf, net.w1, preferred_element_type=jnp.float32) + net.b1,
        0.0).astype(jnp.bfloat16)
    h2 = jnp.maximum(
        jnp.dot(h1, net.w2, preferred_element_type=jnp.float32) + net.b2,
        0.0).astype(jnp.bfloat16)
    ref = jnp.tanh(
        jnp.dot(h2, net.w3, preferred_element_type=jnp.float32) + net.b3)

    assert state.shape == (B, NI)
    assert action.shape == (B, NA)
    assert jnp.allclose(action, ref, atol=1e-2, rtol=1e-2), (
        jnp.max(jnp.abs(action - ref)))

    print("KERNEL_OK")
</pallas_src>

<mosaic_0001>
module attributes {stable_mosaic.version = 11 : i64} {
  func.func @actor_mlp_kernel(%arg0: i32, %arg1: memref<8x128xbf16, #tpu.memory_space<vmem>>, %arg2: memref<128x128xbf16, #tpu.memory_space<vmem>>, %arg3: memref<1x128xf32, #tpu.memory_space<vmem>>, %arg4: memref<128x128xbf16, #tpu.memory_space<vmem>>, %arg5: memref<1x128xf32, #tpu.memory_space<vmem>>, %arg6: memref<128x128xbf16, #tpu.memory_space<vmem>>, %arg7: memref<1x128xf32, #tpu.memory_space<vmem>>, %arg8: memref<8x128xf32, #tpu.memory_space<vmem>>) attributes {dimension_semantics = [#tpu.dimension_semantics<parallel>], iteration_bounds = array<i64: 1>, scalar_prefetch = 0 : i64, scratch_operands = 0 : i64, tpu.core_type = #tpu.core_type<tc>, window_params = [{transform_indices = @transform_0, window_bounds = array<i64: 8, 128>}, {pipeline_mode = #tpu.pipeline_mode<synchronous>, transform_indices = @transform_1, window_bounds = array<i64: 128, 128>}, {pipeline_mode = #tpu.pipeline_mode<synchronous>, transform_indices = @transform_2, window_bounds = array<i64: 1, 128>}, {pipeline_mode = #tpu.pipeline_mode<synchronous>, transform_indices = @transform_3, window_bounds = array<i64: 128, 128>}, {pipeline_mode = #tpu.pipeline_mode<synchronous>, transform_indices = @transform_4, window_bounds = array<i64: 1, 128>}, {pipeline_mode = #tpu.pipeline_mode<synchronous>, transform_indices = @transform_5, window_bounds = array<i64: 128, 128>}, {pipeline_mode = #tpu.pipeline_mode<synchronous>, transform_indices = @transform_6, window_bounds = array<i64: 1, 128>}, {transform_indices = @transform_7, window_bounds = array<i64: 8, 128>}]} {
    %c0 = arith.constant 0 : index
    %c0_0 = arith.constant 0 : index
    %0 = vector.load %arg1[%c0, %c0_0] : memref<8x128xbf16, #tpu.memory_space<vmem>>, vector<8x128xbf16>
    %c0_1 = arith.constant 0 : index
    %c0_2 = arith.constant 0 : index
    %1 = vector.load %arg2[%c0_1, %c0_2] : memref<128x128xbf16, #tpu.memory_space<vmem>>, vector<128x128xbf16>
    %cst = arith.constant dense<0.000000e+00> : vector<8x128xf32>
    %2 = tpu.matmul %0, %1, %cst {dimension_numbers = #tpu.dot_dimension_numbers<[1], [0], [0], [1], [0, 0, 1, 1], [], []>} : vector<8x128xbf16>, vector<128x128xbf16>, vector<8x128xf32> -> vector<8x128xf32>
    %c0_3 = arith.constant 0 : index
    %c0_4 = arith.constant 0 : index
    %3 = vector.load %arg3[%c0_3, %c0_4] : memref<1x128xf32, #tpu.memory_space<vmem>>, vector<1x128xf32>
    %4 = vector.broadcast %3 : vector<1x128xf32> to vector<8x128xf32>
    %5 = arith.addf %2, %4 : vector<8x128xf32>
    %cst_5 = arith.constant 0.000000e+00 : f32
    %6 = vector.broadcast %cst_5 : f32 to vector<8x128xf32>
    %7 = arith.maximumf %5, %6 : vector<8x128xf32>
    %8 = arith.truncf %7 : vector<8x128xf32> to vector<8x128xbf16>
    %c0_6 = arith.constant 0 : index
    %c0_7 = arith.constant 0 : index
    %9 = vector.load %arg4[%c0_6, %c0_7] : memref<128x128xbf16, #tpu.memory_space<vmem>>, vector<128x128xbf16>
    %cst_8 = arith.constant dense<0.000000e+00> : vector<8x128xf32>
    %10 = tpu.matmul %8, %9, %cst_8 {dimension_numbers = #tpu.dot_dimension_numbers<[1], [0], [0], [1], [0, 0, 1, 1], [], []>} : vector<8x128xbf16>, vector<128x128xbf16>, vector<8x128xf32> -> vector<8x128xf32>
    %c0_9 = arith.constant 0 : index
    %c0_10 = arith.constant 0 : index
    %11 = vector.load %arg5[%c0_9, %c0_10] : memref<1x128xf32, #tpu.memory_space<vmem>>, vector<1x128xf32>
    %12 = vector.broadcast %11 : vector<1x128xf32> to vector<8x128xf32>
    %13 = arith.addf %10, %12 : vector<8x128xf32>
    %cst_11 = arith.constant 0.000000e+00 : f32
    %14 = vector.broadcast %cst_11 : f32 to vector<8x128xf32>
    %15 = arith.maximumf %13, %14 : vector<8x128xf32>
    %16 = arith.truncf %15 : vector<8x128xf32> to vector<8x128xbf16>
    %c0_12 = arith.constant 0 : index
    %c0_13 = arith.constant 0 : index
    %17 = vector.load %arg6[%c0_12, %c0_13] : memref<128x128xbf16, #tpu.memory_space<vmem>>, vector<128x128xbf16>
    %cst_14 = arith.constant dense<0.000000e+00> : vector<8x128xf32>
    %18 = tpu.matmul %16, %17, %cst_14 {dimension_numbers = #tpu.dot_dimension_numbers<[1], [0], [0], [1], [0, 0, 1, 1], [], []>} : vector<8x128xbf16>, vector<128x128xbf16>, vector<8x128xf32> -> vector<8x128xf32>
    %c0_15 = arith.constant 0 : index
    %c0_16 = arith.constant 0 : index
    %19 = vector.load %arg7[%c0_15, %c0_16] : memref<1x128xf32, #tpu.memory_space<vmem>>, vector<1x128xf32>
    %20 = vector.broadcast %19 : vector<1x128xf32> to vector<8x128xf32>
    %21 = arith.addf %18, %20 : vector<8x128xf32>
    %22 = math.tanh %21 : vector<8x128xf32>
    %c0_17 = arith.constant 0 : index
    %c0_18 = arith.constant 0 : index
    %23 = vector.load %arg8[%c0_17, %c0_18] : memref<8x128xf32, #tpu.memory_space<vmem>>, vector<8x128xf32>
    tpu.vector_store %arg8[%c0_17, %c0_18], %22 {strides = array<i32>} : memref<8x128xf32, #tpu.memory_space<vmem>>, vector<8x128xf32>,
    return
  }
  func.func @transform_0(%arg0: i32) -> (i32, i32) {
    %c0_i32 = arith.constant 0 : i32
    %c0_i32_0 = arith.constant 0 : i32
    return %arg0, %c0_i32 : i32, i32
  }
  func.func @transform_1(%arg0: i32) -> (i32, i32) {
    %c0_i32 = arith.constant 0 : i32
    %c0_i32_0 = arith.constant 0 : i32
    %c0_i32_1 = arith.constant 0 : i32
    return %c0_i32, %c0_i32_0 : i32, i32
  }
  func.func @transform_2(%arg0: i32) -> (i32, i32) {
    %c0_i32 = arith.constant 0 : i32
    %c0_i32_0 = arith.constant 0 : i32
    %c0_i32_1 = arith.constant 0 : i32
    return %c0_i32, %c0_i32_0 : i32, i32
  }
  func.func @transform_3(%arg0: i32) -> (i32, i32) {
    %c0_i32 = arith.constant 0 : i32
    %c0_i32_0 = arith.constant 0 : i32
    %c0_i32_1 = arith.constant 0 : i32
    return %c0_i32, %c0_i32_0 : i32, i32
  }
  func.func @transform_4(%arg0: i32) -> (i32, i32) {
    %c0_i32 = arith.constant 0 : i32
    %c0_i32_0 = arith.constant 0 : i32
    %c0_i32_1 = arith.constant 0 : i32
    return %c0_i32, %c0_i32_0 : i32, i32
  }
  func.func @transform_5(%arg0: i32) -> (i32, i32) {
    %c0_i32 = arith.constant 0 : i32
    %c0_i32_0 = arith.constant 0 : i32
    %c0_i32_1 = arith.constant 0 : i32
    return %c0_i32, %c0_i32_0 : i32, i32
  }
  func.func @transform_6(%arg0: i32) -> (i32, i32) {
    %c0_i32 = arith.constant 0 : i32
    %c0_i32_0 = arith.constant 0 : i32
    %c0_i32_1 = arith.constant 0 : i32
    return %c0_i32, %c0_i32_0 : i32, i32
  }
  func.func @transform_7(%arg0: i32) -> (i32, i32) {
    %c0_i32 = arith.constant 0 : i32
    %c0_i32_0 = arith.constant 0 : i32
    return %arg0, %c0_i32 : i32, i32
  }
}

</mosaic_0001>

<bundles_post_ra>
// kernel: _actor_forward.1
= control target key start
LH: loop header
LB: loop body
LE: loop exit
PB: predicated region body
PF: predicated region fallthrough
CT: control target
= control target key end

     0   :  { %12 = vsyncpa [#allocation3], 0  ;;  %s712_s0 = inlined_call_operand.vmem [shape: bf16[8,128], index: 0, kind: input, shape index: {}]   ;;  %s713_s1 = inlined_call_operand.hbm [shape: bf16[128,128], index: 1, kind: input, shape index: {}]   ;;  %s714_s2 = inlined_call_operand.vmem [shape: f32[1,128], index: 2, kind: input, shape index: {}]   ;;  %s715_s3 = inlined_call_operand.hbm [shape: bf16[128,128], index: 3, kind: input, shape index: {}]   ;;  %s716_s4 = inlined_call_operand.vmem [shape: f32[1,128], index: 4, kind: input, shape index: {}]   ;;  %s717_s5 = inlined_call_operand.vmem [shape: bf16[128,128], index: 5, kind: input, shape index: {}]   ;;  %s718_s6 = inlined_call_operand.vmem [shape: f32[1,128], index: 6, kind: input, shape index: {}]   ;;  %s719_s7 = inlined_call_operand.vmem [shape: f32[8,128], index: 7, kind: output, shape index: {}]  }
   0x1   :  { %13 = vsyncpa [#allocation5], 0  ;;  %s591_s24 = smov [#allocation2]  }
   0x2   :  { %s21_s25 = sshll.u32 %s591_s24, 4  ;;  %s22_s25 = int_to_ptr.vmem [resolvable:$true] %s21_s25 }
   0x3   :  { %s555_s26 = scalar_lea.vmem %s22_s25, 1024  ;;  %p560_p1 = scmp.lt.s32.totalorder %s22_s25, %s22_s25 }
   0x4   :  { %p556_p0 = scmp.ne.s32.totalorder %s22_s25, %s555_s26  ;;  %p561_p2 = scmp.lt.s32.totalorder %s555_s26, %s555_s26 }
   0x6   :  { %p562_p3 = por %p561_p2, %p560_p1 }
   0x8   :  { %p563_p4 = pnand %p562_p3, %p556_p0 }
   0xa   :  { %566 = shalt.err (!%p563_p4)
}
   0xb   :  { %s592_s27 = smov 64   ;;  %s593_s28 = smov 4  }
   0xc   :  { %27 = dma.hbm_to_vmem [thread:$0]  %s713_s1, 1024, %s22_s25, [#allocation3], %s592_s27, %s592_s27, %s593_s28  }
   0xd   :  { %s594_s8 = smov [#allocation4]  }
   0xe   :  { %s35_s9 = sshll.u32 %s594_s8, 4  ;;  %s36_s9 = int_to_ptr.vmem [resolvable:$true] %s35_s9 }
   0xf   :  { %s575_s10 = scalar_lea.vmem %s36_s9, 1024  ;;  %p580_p6 = scmp.lt.s32.totalorder %s36_s9, %s36_s9 }
  0x10   :  { %p576_p5 = scmp.ne.s32.totalorder %s36_s9, %s575_s10  ;;  %p581_p7 = scmp.lt.s32.totalorder %s575_s10, %s575_s10 }
  0x12   :  { %p582_p8 = por %p581_p7, %p580_p6 }
  0x14   :  { %p583_p9 = pnand %p582_p8, %p576_p5 }
  0x16   :  { %586 = shalt.err (!%p583_p9)
}
  0x17   :  { %41 = dma.hbm_to_vmem [thread:$0]  %s715_s3, 1024, %s36_s9, [#allocation5], %s592_s27, %s592_s27, %s593_s28  }
  0x18   :  { %587 = dma.done.wait [#allocation3], 1024  }
  0x19   :  { %588 = vsyncadd [#allocation3], 4294966272 }
  0x1a   :  { %589 = dma.done.wait [#allocation5], 1024  }
  0x1b   :  { %590 = vsyncadd [#allocation5], 4294966272  ;;  %v595_v0 = vmov 0.0   ;;  %vm596_vm0 = vmmov 0   ;;  %v521_v1 = vld [vmem:[#allocation2 + $0x38] sm:$0xff]   ;;  %v522_v2 = vld [vmem:[#allocation2 + $0x30] sm:$0xff]  }
  0x1c   :  { %455 = vmatprep.subr.bf16.mxu0 %v595_v0  ;;  %471 = vmatprep.mubr.msk.bf16.mxu0 %vm596_vm0, %v595_v0  ;;  %v523_v3 = vld [vmem:[#allocation2 + $0x28] sm:$0xff]   ;;  %v529_v4 = vld [vmem:[#allocation4 + $0x38] sm:$0xff]   ;;  %v524_v5 = vld [vmem:[#allocation2 + $0x20] sm:$0xff]  }
  0x1d   :  { %475 = vmatprep.subr.bf16.mxu1 %v595_v0  ;;  %491 = vmatprep.mubr.msk.bf16.mxu1 %vm596_vm0, %v595_v0  ;;  %v530_v6 = vld [vmem:[#allocation4 + $0x30] sm:$0xff]   ;;  %v525_v7 = vld [vmem:[#allocation2 + $0x18] sm:$0xff]   ;;  %v531_v8 = vld [vmem:[#allocation4 + $0x28] sm:$0xff]  }
  0x1e   :  { %456 = vmatpush3.bf16.msra.mxu0 %v521_v1  ;;  %476 = vmatpush3.bf16.msra.mxu1 %v529_v4  ;;  %v526_v9 = vld [vmem:[#allocation2 + $0x10] sm:$0xff]   ;;  %v532_v10 = vld [vmem:[#allocation4 + $0x20] sm:$0xff]   ;;  %v527_v11 = vld [vmem:[#allocation2 + $0x8] sm:$0xff]  }
  0x1f   :  { %457 = vmatprep.subr.bf16.mxu0 %v595_v0  ;;  %477 = vmatprep.subr.bf16.mxu1 %v595_v0  ;;  %v533_v12 = vld [vmem:[#allocation4 + $0x18] sm:$0xff]   ;;  %v528_v13 = vld [vmem:[#allocation2] sm:$0xff]   ;;  %v534_v14 = vld [vmem:[#allocation4 + $0x10] sm:$0xff]  }
  0x20   :  { %v55_v15 = vld [vmem:[%s712_s0] sm:$0xf]  ;;  %v535_v16 = vld [vmem:[#allocation4 + $0x8] sm:$0xff]   ;;  %v537_v18 = vld [vmem:[%s717_s5 + $0x38] sm:$0xff]  }
  0x21   :  { %v536_v17 = vld [vmem:[#allocation4] sm:$0xff]   ;;  %v538_v19 = vld [vmem:[%s717_s5 + $0x30] sm:$0xff]   ;;  %v539_v20 = vld [vmem:[%s717_s5 + $0x28] sm:$0xff]  }
  0x22   :  { %458 = vmatpush3.bf16.msra.mxu0 %v522_v2  ;;  %478 = vmatpush3.bf16.msra.mxu1 %v530_v6  ;;  %v540_v21 = vld [vmem:[%s717_s5 + $0x20] sm:$0xff]   ;;  %v541_v22 = vld [vmem:[%s717_s5 + $0x18] sm:$0xff]   ;;  %v542_v23 = vld [vmem:[%s717_s5 + $0x10] sm:$0xff]  }
  0x23   :  { %459 = vmatprep.subr.bf16.mxu0 %v595_v0  ;;  %479 = vmatprep.subr.bf16.mxu1 %v595_v0  ;;  %v401_v24 = vld [vmem:[%s714_s2] ss:$0 sm:$0xff]  ;;  %v543_v32 = vld [vmem:[%s717_s5 + $0x8] sm:$0xff]  }
  0x24   :  { %v544_v33 = vld [vmem:[%s717_s5] sm:$0xff]  }
  0x25   :  { %v410_v34 = vld [vmem:[%s716_s4] ss:$0 sm:$0xff] }
  0x26   :  { %460 = vmatpush3.bf16.msra.mxu0 %v523_v3  ;;  %480 = vmatpush3.bf16.msra.mxu1 %v531_v8  ;;  %v419_v42 = vld [vmem:[%s718_s6] ss:$0 sm:$0xff] }
  0x27   :  { %461 = vmatprep.subr.bf16.mxu0 %v595_v0  ;;  %481 = vmatprep.subr.bf16.mxu1 %v595_v0 }
  0x2a   :  { %462 = vmatpush3.bf16.msra.mxu0 %v524_v5  ;;  %482 = vmatpush3.bf16.msra.mxu1 %v532_v10 }
  0x2b   :  { %463 = vmatprep.subr.bf16.mxu0 %v595_v0  ;;  %483 = vmatprep.subr.bf16.mxu1 %v595_v0 }
  0x2e   :  { %464 = vmatpush3.bf16.msra.mxu0 %v525_v7  ;;  %484 = vmatpush3.bf16.msra.mxu1 %v533_v12 }
  0x2f   :  { %465 = vmatprep.subr.bf16.mxu0 %v595_v0  ;;  %485 = vmatprep.subr.bf16.mxu1 %v595_v0 }
  0x32   :  { %466 = vmatpush3.bf16.msra.mxu0 %v526_v9  ;;  %486 = vmatpush3.bf16.msra.mxu1 %v534_v14 }
  0x33   :  { %467 = vmatprep.subr.bf16.mxu0 %v595_v0  ;;  %487 = vmatprep.subr.bf16.mxu1 %v595_v0 }
  0x36   :  { %468 = vmatpush3.bf16.msra.mxu0 %v527_v11  ;;  %488 = vmatpush3.bf16.msra.mxu1 %v535_v16 }
  0x37   :  { %469 = vmatprep.subr.bf16.mxu0 %v595_v0  ;;  %489 = vmatprep.subr.bf16.mxu1 %v595_v0 }
  0x3a   :  { %470 = vmatpush3.bf16.msra.mxu0 %v528_v13  ;;  %490 = vmatpush3.bf16.msra.mxu1 %v536_v17 }
  0x3b   :  { %495 = vmatprep.subr.bf16.mxu0 %v595_v0 }
  0x3d   :  { %472 = vmatmul.mubr.bf16.vlgmr.msra.gmra.mxu0 %v55_v15 }
  0x3e   :  { %511 = vmatprep.mubr.msk.bf16.mxu0 %vm596_vm0, %v595_v0  ;;  %496 = vmatpush3.bf16.msra.mxu0 %v537_v18 }
  0x3f   :  { %497 = vmatprep.subr.bf16.mxu0 %v595_v0 }
  0x42   :  { %498 = vmatpush3.bf16.msra.mxu0 %v538_v19 }
  0x43   :  { %499 = vmatprep.subr.bf16.mxu0 %v595_v0 }
  0x46   :  { %500 = vmatpush3.bf16.msra.mxu0 %v539_v20 }
  0x47   :  { %501 = vmatprep.subr.bf16.mxu0 %v595_v0 }
  0x4a   :  { %502 = vmatpush3.bf16.msra.mxu0 %v540_v21 }
  0x4b   :  { %503 = vmatprep.subr.bf16.mxu0 %v595_v0 }
  0x4e   :  { %504 = vmatpush3.bf16.msra.mxu0 %v541_v22 }
  0x4f   :  { %505 = vmatprep.subr.bf16.mxu0 %v595_v0 }
  0x52   :  { %506 = vmatpush3.bf16.msra.mxu0 %v542_v23 }
  0x53   :  { %507 = vmatprep.subr.bf16.mxu0 %v595_v0 }
  0x56   :  { %508 = vmatpush3.bf16.msra.mxu0 %v543_v32 }
  0x57   :  { %509 = vmatprep.subr.bf16.mxu0 %v595_v0 }
  0x5a   :  { %510 = vmatpush3.bf16.msra.mxu0 %v544_v33 }
  0xfd   :  { %v161_v25 = vpop.f32.mrf.mxu0 }
  0xfe   :  { %v162_v26 = vadd.f32 %v401_v24, %v161_v25 }
  0xff   :  { %v473_v27 = vpop.f32.mrf.mxu0 }
 0x100   :  { %v167_v28 = vmax.f32 %v162_v26, 0.0 }
 0x101   :  { %v164_v29 = vpop.f32.mrf.mxu0 }
 0x102   :  { %v168_v30 = vpack.c.bf16 %v167_v28, %v167_v28 }
 0x103   :  { %v474_v31 = vpop.f32.mrf.mxu0 }
 0x104   :  { %492 = vmatmul.mubr.bf16.vlgmr.msra.gmra.mxu1 %v168_v30 }
 0x1c4   :  { %v274_v35 = vpop.f32.mrf.mxu1 }
 0x1c5   :  { %v275_v36 = vadd.f32 %v410_v34, %v274_v35 }
 0x1c6   :  { %v493_v37 = vpop.f32.mrf.mxu1 }
 0x1c7   :  { %v280_v38 = vmax.f32 %v275_v36, 0.0 }
 0x1c8   :  { %v277_v39 = vpop.f32.mrf.mxu1 }
 0x1c9   :  { %v281_v40 = vpack.c.bf16 %v280_v38, %v280_v38 }
 0x1ca   :  { %v494_v41 = vpop.f32.mrf.mxu1 }
 0x1cb   :  { %512 = vmatmul.mubr.bf16.vlgmr.msra.gmra.mxu0 %v281_v40 }
 0x28b   :  { %v387_v43 = vpop.f32.mrf.mxu0 }
 0x28c   :  { %v388_v44 = vadd.f32 %v419_v42, %v387_v43 }
 0x28d   :  { %v513_v45 = vpop.f32.mrf.mxu0 }
 0x28e   :  { %545 = vtanh.f32 %v388_v44 }
 0x28f   :  { %v390_v46 = vpop.f32.mrf.mxu0 }
 0x291   :  { %v514_v47 = vpop.f32.mrf.mxu0 }
 0x29b   :  { %v546_v48 = vpop.eup %545 }
 0x29c   :  { %394 = vst [vmem:[%s719_s7] sm:$0xff] %v546_v48 }
 0x29d   :  { %399 = vsyncpa [#allocation3], 1 }
 0x29e   :  { %400 = vsyncpa [#allocation5], 1 }

</bundles_post_ra>
